<compile_context>
chip_gen: v5e
topology: v5e:2x2
jax: 0.10.0
libtpu: 0.0.40
codegen_flags: <defaults>
</compile_context>

<pallas_src>
import functools

import jax
import jax.numpy as jnp
from jax.experimental import pallas as pl
from jax.experimental.pallas import tpu as pltpu

_LANE = 128      # lane width (last-dim tile)
_SUBLANE = 8     # f32 sublane count (second-to-last-dim tile)


def _round_up(v, m):
    return (v + m - 1) // m * m


def _vmem_limit_bytes():
    # ~3/4 of physical VMEM: ~96 MiB on v5e/v6e (above the 16/32 MiB scoped
    # default), ~48 MiB on v7x (safely under its 64 MiB).
    try:
        cap = int(pltpu.get_tpu_info().vmem_capacity_bytes)
        return cap * 3 // 4
    except Exception:
        return 48 * 1024 * 1024


def _pad_input(x, Hp):
    """Pad (B, H) f32 -> (Bp, Hp): sublane-multiple batch, lane-multiple feats."""
    B, _H = x.shape
    if B <= _LANE:
        Bp = _round_up(B, _SUBLANE)
        tb = Bp
    else:
        Bp = _round_up(B, _LANE)
        tb = _LANE
    xp = jnp.zeros((Bp, Hp), jnp.float32).at[:B, :_H].set(x)
    return xp, tb


# ----------------------------------------------------------------------------
# Fused kernel: sequential / residual / highway.
# Grid = (batch_tiles, n_layers); out_ref is the VMEM-resident carry.
# ----------------------------------------------------------------------------
def _stacked_kernel(x_ref, w_ref, b_ref, out_ref, *, connectivity, Hp):
    l = pl.program_id(1)

    @pl.when(l == 0)
    def _init():
        out_ref[...] = x_ref[...]

    prev = out_ref[...]                                       # f32 carry
    acc = jnp.dot(prev.astype(w_ref.dtype), w_ref[...],      # bf16 MXU, f32 acc
                  preferred_element_type=jnp.float32) + b_ref[...]

    if connectivity == "sequential":
        out_ref[...] = acc

    elif connectivity == "residual":
        @pl.when(l == 0)
        def _():
            out_ref[...] = acc

        @pl.when(l > 0)
        def _():
            out_ref[...] = acc + prev

    elif connectivity == "highway":
        new = acc[:, :Hp]                                     # layer output half

        @pl.when(l == 0)
        def _():
            out_ref[...] = new

        @pl.when(l > 0)
        def _():
            gate = jax.nn.sigmoid(acc[:, Hp:])                # gate-logit half
            out_ref[...] = gate * prev + (1.0 - gate) * new

    else:
        raise ValueError(connectivity)


def _run_stacked(x_p, tb, W, Bv, connectivity, Hp):
    Bp = x_p.shape[0]
    nb = Bp // tb
    L = W.shape[0]
    out_w = W.shape[2]                       # Hp, or 2*Hp for highway (packed)
    kernel = functools.partial(_stacked_kernel, connectivity=connectivity, Hp=Hp)
    return pl.pallas_call(
        kernel,
        out_shape=jax.ShapeDtypeStruct((Bp, Hp), jnp.float32),
        grid_spec=pltpu.PrefetchScalarGridSpec(
            num_scalar_prefetch=0,
            grid=(nb, L),
            in_specs=[
                pl.BlockSpec((tb, Hp), lambda b, l: (b, 0)),            # x
                pl.BlockSpec((None, Hp, out_w), lambda b, l: (l, 0, 0)),  # W (bf16)
                pl.BlockSpec((None, 1, out_w), lambda b, l: (l, 0, 0)),   # bias (f32)
            ],
            out_specs=pl.BlockSpec((tb, Hp), lambda b, l: (b, 0)),      # carry
        ),
        compiler_params=pltpu.CompilerParams(
            dimension_semantics=("parallel", "arbitrary"),
            vmem_limit_bytes=_vmem_limit_bytes()),
    )(x_p, W, Bv)


# ----------------------------------------------------------------------------
# Fused kernel: concat / concat_input.
# Grid = (batch_tiles, T) where T enumerates ragged (Hp x Hp) weight row-blocks.
# out_ref (n_slots, tb, Hp) is the VMEM-resident concat buffer; scalar-prefetch
# tables give per-block source slot, dest slot, layer index, and first-of-layer.
# ----------------------------------------------------------------------------
def _concat_kernel(src_ref, dst_ref, first_ref, layer_ref,
                   x_ref, w_ref, b_ref, out_ref, *, x_slot):
    del layer_ref  # only used inside the bias index_map
    t = pl.program_id(1)

    @pl.when(t == 0)
    def _init():
        out_ref[x_slot] = x_ref[...]          # place the network input slot

    src = src_ref[t]
    dst = dst_ref[t]

    contrib = jnp.dot(out_ref[src].astype(w_ref.dtype), w_ref[...],
                      preferred_element_type=jnp.float32)

    @pl.when(first_ref[t] == 1)               # first row-block of this layer
    def _start_layer():
        out_ref[dst] = contrib + b_ref[...]

    @pl.when(first_ref[t] == 0)               # accumulate remaining row-blocks
    def _accumulate():
        out_ref[dst] = out_ref[dst] + contrib


def _run_concat(x_p, tb, meta, W_flat, Bv, n_slots, x_slot, Hp):
    Bp = x_p.shape[0]
    nb = Bp // tb
    T = W_flat.shape[0]
    src, dst, first, layer = meta
    kernel = functools.partial(_concat_kernel, x_slot=x_slot)
    return pl.pallas_call(
        kernel,
        out_shape=jax.ShapeDtypeStruct((n_slots, Bp, Hp), jnp.float32),
        grid_spec=pltpu.PrefetchScalarGridSpec(
            num_scalar_prefetch=4,
            grid=(nb, T),
            in_specs=[
                pl.BlockSpec((tb, Hp), lambda b, t, *s: (b, 0)),            # x
                pl.BlockSpec((None, Hp, Hp), lambda b, t, *s: (t, 0, 0)),   # W blocks
                pl.BlockSpec((None, 1, Hp),
                             lambda b, t, src, dst, first, layer:
                             (layer[t], 0, 0)),                             # bias
            ],
            out_specs=pl.BlockSpec((n_slots, tb, Hp),
                                   lambda b, t, *s: (0, b, 0)),             # buffer
        ),
        compiler_params=pltpu.CompilerParams(
            dimension_semantics=("parallel", "arbitrary"),
            vmem_limit_bytes=_vmem_limit_bytes()),
    )(src, dst, first, layer, x_p, W_flat, Bv)


# ----------------------------------------------------------------------------
# Network: mirrors the PyTorch base-class forward pass.
# ----------------------------------------------------------------------------
class Network:
    def __init__(self, n_layers, hidden, connectivity="sequential", seed=0):
        self.n_layers = n_layers
        self.hidden = hidden
        self.connectivity = connectivity
        self.Hp = _round_up(hidden, _LANE)

        H, Hp, L = hidden, self.Hp, n_layers
        key = jax.random.PRNGKey(seed)

        # Per-layer parameters (weights stored bf16; biases stay f32 — they are
        # added to the f32 accumulator and their bytes are negligible).
        self.Ws, self.bs, self.Wgs, self.bgs = [], [], [], []
        for l in range(L):
            if connectivity == "concat":
                in_dim = H * (l + 1)
            elif connectivity == "concat_input":
                in_dim = H if l == 0 else 2 * H
            else:
                in_dim = H
            bound = 1.0 / float(in_dim) ** 0.5
            key, k1, k2, k3, k4 = jax.random.split(key, 5)
            self.Ws.append(jax.random.uniform(
                k1, (in_dim, H), jnp.float32, -bound, bound).astype(jnp.bfloat16))
            self.bs.append(jax.random.uniform(
                k2, (1, H), jnp.float32, -bound, bound))
            self.Wgs.append(jax.random.uniform(
                k3, (in_dim, H), jnp.float32, -bound, bound).astype(jnp.bfloat16))
            self.bgs.append(jax.random.uniform(
                k4, (1, H), jnp.float32, -bound, bound))

        # ---- pre-pack padded / fused weight tensors for the kernels --------
        if connectivity in ("sequential", "residual"):
            W = jnp.zeros((L, Hp, Hp), jnp.float32)
            Bv = jnp.zeros((L, 1, Hp), jnp.float32)
            for l in range(L):
                W = W.at[l, :H, :H].set(self.Ws[l].astype(jnp.float32))
                Bv = Bv.at[l, 0, :H].set(self.bs[l][0])
            self._W, self._B = W.astype(jnp.bfloat16), Bv

        elif connectivity == "highway":
            # Pack layer + gate weights along the output dim: one weight DMA
            # stream and one MXU push per layer.
            W = jnp.zeros((L, Hp, 2 * Hp), jnp.float32)
            Bv = jnp.zeros((L, 1, 2 * Hp), jnp.float32)
            for l in range(L):
                W = W.at[l, :H, :H].set(self.Ws[l].astype(jnp.float32))
                W = W.at[l, :H, Hp:Hp + H].set(self.Wgs[l].astype(jnp.float32))
                Bv = Bv.at[l, 0, :H].set(self.bs[l][0])
                Bv = Bv.at[l, 0, Hp:Hp + H].set(self.bgs[l][0])
            self._W, self._B = W.astype(jnp.bfloat16), Bv

        else:  # concat / concat_input : ragged weights -> flat (Hp x Hp) blocks
            self._n_slots = L + 1 if connectivity == "concat" else 2
            self._x_slot = L if connectivity == "concat" else 1
            src, dst, first, layer, blocks = [], [], [], [], []
            Bv = jnp.zeros((L, 1, Hp), jnp.float32)
            for l in range(L):
                Bv = Bv.at[l, 0, :H].set(self.bs[l][0])
                Wl = self.Ws[l].astype(jnp.float32)
                n_in = Wl.shape[0] // H
                for j in range(n_in):
                    if connectivity == "concat":
                        # input ordering: [new_{l-1},...,new_0, x] = slots L-l..L
                        src.append(L - l + j)
                        dst.append(L - 1 - l)
                    else:  # concat_input: slot 0 = latest new, slot 1 = x
                        src.append(1 if (l == 0 or j == 1) else 0)
                        dst.append(0)
                    first.append(1 if j == 0 else 0)
                    layer.append(l)
                    blk = jnp.zeros((Hp, Hp), jnp.float32)
                    blk = blk.at[:H, :H].set(Wl[j * H:(j + 1) * H, :])
                    blocks.append(blk)
            self._W = jnp.stack(blocks).astype(jnp.bfloat16)   # (T, Hp, Hp)
            self._B = Bv                                       # (L, 1, Hp)
            self._meta = (jnp.asarray(src, jnp.int32),
                          jnp.asarray(dst, jnp.int32),
                          jnp.asarray(first, jnp.int32),
                          jnp.asarray(layer, jnp.int32))

    # ----- forward (Pallas) -------------------------------------------------
    def __call__(self, x):
        B, H = x.shape
        Hp = self.Hp
        x_p, tb = _pad_input(x.astype(jnp.float32), Hp)

        if self.connectivity in ("sequential", "residual", "highway"):
            out = _run_stacked(x_p, tb, self._W, self._B, self.connectivity, Hp)
            return out[:B, :H]

        out = _run_concat(x_p, tb, self._meta, self._W, self._B,
                          self._n_slots, self._x_slot, Hp)
        return jnp.concatenate([out[s, :B, :H] for s in range(self._n_slots)],
                               axis=1)

    # ----- pure-JAX reference (same bf16-weight / f32-accumulate numerics) ---
    def reference(self, x):
        def lin(a, w, b):
            return jnp.dot(a.astype(jnp.bfloat16), w,
                           preferred_element_type=jnp.float32) + b

        x = x.astype(jnp.float32)
        out = x
        for l in range(self.n_layers):
            new_out = lin(out, self.Ws[l], self.bs[l])
            if self.connectivity == "sequential":
                out = new_out
            elif self.connectivity == "residual":
                out = new_out if l == 0 else new_out + out
            elif self.connectivity == "highway":
                if l > 0:
                    gate = jax.nn.sigmoid(lin(out, self.Wgs[l], self.bgs[l]))
                    out = gate * out + (1.0 - gate) * new_out
                else:
                    out = new_out
            elif self.connectivity == "concat":
                out = jnp.concatenate([new_out, out], axis=1)
            elif self.connectivity == "concat_input":
                out = jnp.concatenate([new_out, x], axis=1)
        return out


if __name__ == "__main__":
    B, H, L = 2, 32, 3
    x = jax.random.normal(jax.random.PRNGKey(0), (B, H), jnp.float32)

    for conn in ("sequential", "residual", "highway", "concat", "concat_input"):
        net = Network(L, H, connectivity=conn, seed=0)
        out = jax.block_until_ready(net(x))
        ref = net.reference(x)
        assert out.shape == ref.shape, (conn, out.shape, ref.shape)
        assert jnp.allclose(out, ref, rtol=1e-2, atol=1e-2), (
            conn, float(jnp.max(jnp.abs(out - ref))))

    print("KERNEL_OK")
</pallas_src>

<mosaic_0001>
module attributes {stable_mosaic.version = 11 : i64} {
  func.func @_stacked_kernel(%arg0: i32, %arg1: i32, %arg2: memref<8x128xf32, #tpu.memory_space<vmem>>, %arg3: memref<1x128x128xbf16, #tpu.memory_space<vmem>>, %arg4: memref<1x1x128xf32, #tpu.memory_space<vmem>>, %arg5: memref<8x128xf32, #tpu.memory_space<vmem>>) attributes {dimension_semantics = [#tpu.dimension_semantics<parallel>, #tpu.dimension_semantics<arbitrary>], iteration_bounds = array<i64: 1, 3>, scalar_prefetch = 0 : i64, scratch_operands = 0 : i64, tpu.core_type = #tpu.core_type<tc>, window_params = [{transform_indices = @transform_0, window_bounds = array<i64: 8, 128>}, {transform_indices = @transform_1, window_bounds = array<i64: 1, 128, 128>}, {transform_indices = @transform_2, window_bounds = array<i64: 1, 1, 128>}, {transform_indices = @transform_3, window_bounds = array<i64: 8, 128>}]} {
    %c0_i32 = arith.constant 0 : i32
    %0 = arith.cmpi eq, %arg1, %c0_i32 : i32
    %1 = arith.extui %0 : i1 to i32
    %c0_i32_0 = arith.constant 0 : i32
    %2 = arith.cmpi ne, %1, %c0_i32_0 : i32
    scf.if %2 {
      %c0_10 = arith.constant 0 : index
      %c0_11 = arith.constant 0 : index
      %13 = vector.load %arg2[%c0_10, %c0_11] : memref<8x128xf32, #tpu.memory_space<vmem>>, vector<8x128xf32>
      %c0_12 = arith.constant 0 : index
      %c0_13 = arith.constant 0 : index
      %14 = vector.load %arg5[%c0_12, %c0_13] : memref<8x128xf32, #tpu.memory_space<vmem>>, vector<8x128xf32>
      tpu.vector_store %arg5[%c0_12, %c0_13], %13 {strides = array<i32>} : memref<8x128xf32, #tpu.memory_space<vmem>>, vector<8x128xf32>,
    } else {
    }
    %c0 = arith.constant 0 : index
    %c0_1 = arith.constant 0 : index
    %3 = vector.load %arg5[%c0, %c0_1] : memref<8x128xf32, #tpu.memory_space<vmem>>, vector<8x128xf32>
    %4 = arith.truncf %3 : vector<8x128xf32> to vector<8x128xbf16>
    %c0_2 = arith.constant 0 : index
    %c0_3 = arith.constant 0 : index
    %c0_4 = arith.constant 0 : index
    %5 = vector.load %arg3[%c0_2, %c0_3, %c0_4] : memref<1x128x128xbf16, #tpu.memory_space<vmem>>, vector<1x128x128xbf16>
    %6 = vector.shape_cast %5 : vector<1x128x128xbf16> to vector<128x128xbf16>
    %cst = arith.constant dense<0.000000e+00> : vector<8x128xf32>
    %7 = tpu.matmul %4, %6, %cst {dimension_numbers = #tpu.dot_dimension_numbers<[1], [0], [0], [1], [0, 0, 1, 1], [], []>} : vector<8x128xbf16>, vector<128x128xbf16>, vector<8x128xf32> -> vector<8x128xf32>
    %c0_5 = arith.constant 0 : index
    %c0_6 = arith.constant 0 : index
    %c0_7 = arith.constant 0 : index
    %8 = vector.load %arg4[%c0_5, %c0_6, %c0_7] : memref<1x1x128xf32, #tpu.memory_space<vmem>>, vector<1x1x128xf32>
    %9 = vector.shape_cast %8 : vector<1x1x128xf32> to vector<1x128xf32>
    %10 = vector.broadcast %9 : vector<1x128xf32> to vector<8x128xf32>
    %11 = arith.addf %7, %10 : vector<8x128xf32>
    %c0_8 = arith.constant 0 : index
    %c0_9 = arith.constant 0 : index
    %12 = vector.load %arg5[%c0_8, %c0_9] : memref<8x128xf32, #tpu.memory_space<vmem>>, vector<8x128xf32>
    tpu.vector_store %arg5[%c0_8, %c0_9], %11 {strides = array<i32>} : memref<8x128xf32, #tpu.memory_space<vmem>>, vector<8x128xf32>,
    return
  }
  func.func @transform_0(%arg0: i32, %arg1: i32) -> (i32, i32) {
    %c0_i32 = arith.constant 0 : i32
    %c0_i32_0 = arith.constant 0 : i32
    return %arg0, %c0_i32 : i32, i32
  }
  func.func @transform_1(%arg0: i32, %arg1: i32) -> (i32, i32, i32) {
    %c0_i32 = arith.constant 0 : i32
    %c0_i32_0 = arith.constant 0 : i32
    %c0_i32_1 = arith.constant 0 : i32
    return %arg1, %c0_i32, %c0_i32_0 : i32, i32, i32
  }
  func.func @transform_2(%arg0: i32, %arg1: i32) -> (i32, i32, i32) {
    %c0_i32 = arith.constant 0 : i32
    %c0_i32_0 = arith.constant 0 : i32
    %c0_i32_1 = arith.constant 0 : i32
    return %arg1, %c0_i32, %c0_i32_0 : i32, i32, i32
  }
  func.func @transform_3(%arg0: i32, %arg1: i32) -> (i32, i32) {
    %c0_i32 = arith.constant 0 : i32
    %c0_i32_0 = arith.constant 0 : i32
    return %arg0, %c0_i32 : i32, i32
  }
}

</mosaic_0001>

<bundles_post_ra>
// kernel: tpu_custom_call.1
= control target key start
LH: loop header
LB: loop body
LE: loop exit
PB: predicated region body
PF: predicated region fallthrough
CT: control target
= control target key end

     0   :  { %8 = vsyncpa [#allocation3], 0  ;;  %s914_s0 = inlined_call_operand.hbm [shape: f32[8,128], index: 0, kind: input, shape index: {}]   ;;  %s915_s1 = inlined_call_operand.hbm [shape: bf16[3,128,128], index: 1, kind: input, shape index: {}]   ;;  %s916_s2 = inlined_call_operand.hbm [shape: f32[3,1,128], index: 2, kind: input, shape index: {}]   ;;  %s917_s3 = inlined_call_operand.hbm [shape: f32[8,128], index: 3, kind: output, shape index: {}]  }
   0x1   :  { %9 = vsyncpa [#allocation6], 0 }
   0x2   :  { %11 = vsyncpa [#allocation6 + $0x1], 0 }
   0x3   :  { %12 = vsyncpa [#allocation4], 0  ;;  %s781_s12 = smov 0   ;;  %s783_s13 = smov 0  }
   0x4   :  { %s785_s14 = smov 0   ;;  %s787_s15 = smov 0  }
   0x5   :  { %s789_s16 = smov 0   ;;  %s791_s17 = smov 0  }
   0x6 LB: > { %s27_s18 = sadd.s32 1, %s751_s16  ;;  %s63_s19 = sadd.s32 1, %s743_s14  ;;  %s755_s17 = sphi %s791_s17, %s18_s17   ;;  %s751_s16 = sphi %s789_s16, %s926_s16   ;;  %s747_s15 = sphi %s787_s15, %s925_s15   ;;  %s743_s14 = sphi %s785_s14, %s924_s14   ;;  %s739_s13 = sphi %s783_s13, %s923_s13   ;;  %s735_s12 = sphi %s781_s12, %s922_s12  }
   0x7   : > { %p28_p0 = scmp.ge.s32.totalorder %s27_s18, 3  ;;  %p70_p1 = scmp.ne.s32.totalorder %s743_s14, %s739_s13 }
   0x8   : > { %p71_p2 = scmp.eq.s32.totalorder %s755_s17, 0  ;;  %p522_p4 = scmp.lt.s32.totalorder %s755_s17, 3 }
   0x9   : > { %s928_s18 = smov (%p28_p0, %s27_s18), 0  ;;  %s166_s22 = sand.u32 1, %s755_s17  }
   0xa   : > { %p818_p3 = por %p71_p2, %p70_p1  ;;  %s60_s21 = ssub.s32 %s751_s16, %s928_s18 }
   0xb   : > { %p61_p5 = scmp.eq.s32.totalorder %s60_s21, 0  ;;  %s168_s23 = sand.u32 1, %s743_s14  }
   0xc   : > { %s489_s24 = sshll.u32 %s751_s16, 6  ;;  %s446_s26 = sshll.u32 %s168_s23, 6 }
   0xd   : > { %s829_s25 = scalar_select %p61_p5, %s743_s14, %s63_s19  }
   0xe   : > { %s175_s29 = scalar_lea.hbm %s915_s1, %s489_s24  ;;  %s170_s4 = scalar_lea.vmem [#allocation5], %s446_s26 }
   0xf   : > { %s176_s30 = sshll.u32 %s175_s29, 4  ;;  %s178_s5 = sshll.u32 %s170_s4, 4  ;;  %s177_s30 = int_to_ptr.hbm [resolvable:$true] %s176_s30  ;;  %s179_s5 = int_to_ptr.vmem [resolvable:$true] %s178_s5 }
  0x10   : > { %p840_p6 = pnand %p522_p4, %p818_p3  ;;  %s167_s7 = scalar_lea.sflag [#allocation6], %s166_s22 }
  0x11   : > { %s757_s8 = smov 64   ;;  %s758_s9 = smov 4  }
  0x12   : > { %517 = dma.hbm_to_vmem [thread:$0]  (!%p840_p6), %s177_s30, 1024, %s179_s5, %s167_s7, %s757_s8, %s757_s8, %s758_s9  }
  0x13   : > { %s847_s10 = sadd.s32 4294967295, %s755_s17   ;;  %p76_p7 = scmp.ne.s32.totalorder %s739_s13, %s735_s12 }
  0x14   : > { %p77_p8 = scmp.eq.s32.totalorder %s847_s10, 0  ;;  %p443_p9 = scmp.ge.s32.totalorder %s755_s17, 1 }
  0x15   : > { %p139_p10 = scmp.lt.s32.totalorder %s755_s17, 4  ;;  %s153_s22 = sshll.u32 %s914_s0, 4  ;;  %s154_s22 = int_to_ptr.hbm [resolvable:$true] %s153_s22 }
  0x16   : > { %p856_p11 = por %p77_p8, %p76_p7  ;;  %s759_s12 = smov [#allocation2]  }
  0x17   : > { %p860_p12 = pnand %p443_p9, %p139_p10  ;;  %s155_s24 = sshll.u32 %s759_s12, 4  ;;  %s156_s24 = int_to_ptr.vmem [resolvable:$true] %s155_s24 }
  0x18   : > { %s194_s28 = scalar_lea.hbm %s916_s2, %s751_s16  ;;  %s191_s30 = scalar_lea.vmem [#allocation7], %s168_s23 }
  0x19   : > { %p510_p13 = pneg %p860_p12  ;;  %s196_s29 = sshll.u32 %s194_s28, 4  ;;  %s197_s29 = int_to_ptr.hbm [resolvable:$true] %s196_s29 }
  0x1a   : > { %s198_s4 = sshll.u32 %s191_s30, 4  ;;  %207 = sbr.rel (%p860_p12) target bundleno = 213 (0xd5), region = 32  ;;  %s199_s4 = int_to_ptr.vmem [resolvable:$true] %s198_s4 }
  0x1b   : > { %p511_p0 = pnand %p510_p13, %p77_p8 }
  0x1c   : > { %520 = dma.hbm_to_vmem [thread:$0]  (!%p840_p6), %s197_s29, 16, %s199_s4, %s167_s7  }
  0x1d   : > { %513 = dma.hbm_to_vmem [thread:$0]  (!%p511_p0), %s154_s22, 128, %s156_s24, [#allocation3]  }
  0x1f   : > { %722 = dma.done.wait (%p77_p8), [#allocation3], 128  }
  0x20   : > { %724 = vsyncadd (%p77_p8), [#allocation3], 4294967168  ;;  %s214_s5 = sand.u32 1, %s847_s10   ;;  %s216_s23 = sand.u32 1, %s739_s13  }
  0x21   : > { %s451_s8 = sshll.u32 %s216_s23, 6  ;;  %s215_s9 = scalar_lea.sflag [#allocation6], %s214_s5 }
  0x22   : > { %s218_s20 = scalar_lea.vmem [#allocation5], %s451_s8 }
  0x23   : > { %726 = dma.done.wait (%p856_p11), %s215_s9, 1040  }
  0x24   : > { %728 = vsyncadd (%p856_p11), %s215_s9, 4294966256  ;;  %s227_s6 = scalar_lea.vmem [#allocation7], %s216_s23  ;;  %p452_p1 = scmp.ne.s32.totalorder %s747_s15, 0 }
  0x26   : > { %253 = sbr.rel (%p452_p1) target bundleno = 45 (0x2d), region = 48 }
  0x2b   : > { %v254_v0 = vld [vmem:[#allocation2] sm:$0xff] }
  0x2c   : > { %255 = vst [vmem:[#allocation8] sm:$0xff] %v254_v0 }
  0x2d PF: > { %v497_v1 = vld [vmem:[%s218_s20 + $0x38] sm:$0xff]  ;;  %v496_v2 = vld [vmem:[%s218_s20 + $0x30] sm:$0xff]  ;;  %v495_v3 = vld [vmem:[%s218_s20 + $0x28] sm:$0xff]  ;;  %s760_s15 = smov [#allocation8]   ;;  %s350_s21 = sshll.u32 %s917_s3, 4  ;;  %s351_s21 = int_to_ptr.hbm [resolvable:$true] %s350_s21 }
  0x2e   : > { %326 = vmatpush.bf16.msra.mxu0 %v497_v1  ;;  %v494_v4 = vld [vmem:[%s218_s20 + $0x20] sm:$0xff]  ;;  %v493_v5 = vld [vmem:[%s218_s20 + $0x18] sm:$0xff]  ;;  %v492_v6 = vld [vmem:[%s218_s20 + $0x10] sm:$0xff]  ;;  %s348_s7 = sshll.u32 %s760_s15, 4  ;;  %p524_p2 = scmp.eq.s32.totalorder %s847_s10, 2  ;;  %s349_s7 = int_to_ptr.vmem [resolvable:$true] %s348_s7 }
  0x2f   : > { %v491_v7 = vld [vmem:[%s218_s20 + $0x8] sm:$0xff]  ;;  %v490_v8 = vld [vmem:[%s218_s20] sm:$0xff]  ;;  %v578_v11 = vld [vmem:[%s227_s6] ss:$0 sm:$0xff] }
  0x32   : > { %327 = vmatpush.bf16.msra.mxu0 %v496_v2 }
  0x33   : > { %v256_v9 = vld [vmem:[#allocation8] sm:$0xff] }
  0x34   : > { %v257_v10 = vpack.c.bf16 %v256_v9, %v256_v9 }
  0x36   : > { %328 = vmatpush.bf16.msra.mxu0 %v495_v3 }
  0x3a   : > { %329 = vmatpush.bf16.msra.mxu0 %v494_v4 }
  0x3e   : > { %330 = vmatpush.bf16.msra.mxu0 %v493_v5 }
  0x42   : > { %331 = vmatpush.bf16.msra.mxu0 %v492_v6 }
  0x46   : > { %332 = vmatpush.bf16.msra.mxu0 %v491_v7 }
  0x4a   : > { %333 = vmatpush.bf16.msra.mxu0 %v490_v8 }
  0x4d   : > { %334 = vmatmul.bf16.vlgmr.msra.gmra.mxu0 %v257_v10 }
  0xca   : > { %v335_v12 = vpop.f32.mrf.mxu0 }
  0xcb   : > { %v336_v13 = vadd.f32 %v578_v11, %v335_v12 }
  0xcd   : > { %339 = vst [vmem:[#allocation8] sm:$0xff] %v336_v13 }
  0xce   : > { %507 = dma.vmem_to_hbm [thread:$0]  (%p524_p2), %s349_s7, 128, %s351_s21, [#allocation4]  }
  0xd2   : > { %v337_v14 = vpop.f32.mrf.mxu0 }
  0xd3   : > { %730 = dma.done.wait (%p524_p2), [#allocation4], 128  }
  0xd4   : > { %732 = vsyncadd (%p524_p2), [#allocation4], 4294967168 }
  0xd5 PF: > { %s18_s17 = sadd.s32 1, %s755_s17   ;;  %s922_s12 = smov %s739_s13 }
  0xd6   : > { %p15_p3 = scmp.ge.s32.totalorder %s18_s17, 5   ;;  %s923_s13 = smov %s743_s14 }
  0xd7   : > { %s924_s14 = smov %s829_s25  ;;  %s925_s15 = smov %s751_s16 }
  0xd8   : > { %s926_s16 = smov %s928_s18  ;;  %17 = sbr.rel (!%p15_p3) target bundleno = 6 (0x6), region = 91 }
  0xdd   :  { %364 = vsyncpa [#allocation3], 1 }
  0xde   :  { %366 = vsyncpa [#allocation3 + $0x1], 1 }
  0xdf   :  { %367 = vsyncpa [#allocation6], 1 }
  0xe0   :  { %369 = vsyncpa [#allocation6 + $0x1], 1 }
  0xe1   :  { %370 = vsyncpa [#allocation4], 1 }
  0xe2   :  { %372 = vsyncpa [#allocation4 + $0x1], 1 }

</bundles_post_ra>
